<compile_context>
chip_gen: v7x
topology: tpu7x:2x2x1
jax: 0.10.0
libtpu: 0.0.40
codegen_flags: <defaults>
</compile_context>

<pallas_src>
import math

import jax
import jax.numpy as jnp
from jax.experimental import pallas as pl
from jax.experimental.pallas import tpu as pltpu

K_TOP = 5  # module's self.K

_PAD_SENTINEL = -3.0    # padded hyperedge columns (never selectable)
_KNOCK_SENTINEL = -2.0  # knocked-out entries during top-K (below clip range)
_MAX_ROWS_PER_STEP = 128  # target MXU M per grid step (G * n_pad)


def _round_up(v, m):
    return ((v + m - 1) // m) * m


def _pad_to(a, shape):
    pads = [(0, s - d) for d, s in zip(a.shape, shape)]
    if any(p[1] for p in pads):
        return jnp.pad(a, pads)
    return a


def prepare_params(w, b, centers):
    """Pad parameters ONCE at setup time (keeps HBM copies out of the hot path).

    w: (Fin, Fout)  -- nn.Linear weight already transposed to (in, out).
    b: (Fout,);  centers: (E, Fout).
    """
    fin, fout = w.shape
    e = centers.shape[0]
    assert e >= K_TOP, f"need at least K={K_TOP} hyperedges (got {e})"
    f_pad = _round_up(fout, 128)
    e_pad = _round_up(e, 128)
    return dict(
        wp=_pad_to(jnp.asarray(w, jnp.float32), (fin, f_pad)),
        bp=_pad_to(jnp.asarray(b, jnp.float32).reshape(1, fout), (1, f_pad)),
        cp=_pad_to(jnp.asarray(centers, jnp.float32), (e_pad, f_pad)),
        fin=fin, fout=fout, e=e, f_pad=f_pad, e_pad=e_pad,
    )


def _make_kernel(g, n_real, n_pad, e_real, e_pad, f_pad, k_top):
    """Kernel factory. One grid step processes G graphs (G*n_pad flat rows)."""
    gn = g * n_pad

    def kernel(x_ref, w_ref, b_ref, c_ref, alpha_ref, out_ref):
        alpha = alpha_ref[0]                   # scalar via SMEM
        x = x_ref[...]                         # (G*n_pad, Fin)
        w = w_ref[...]                         # (Fin, F_pad)
        bias = b_ref[...]                      # (1, F_pad)
        centers = c_ref[...]                   # (E_pad, F_pad)

        # ---- mlp: Linear + Tanh, ONE MXU call with M = G*n_pad -------------
        x_proj = jnp.tanh(
            jnp.dot(x, w, preferred_element_type=jnp.float32) + bias)

        # Zero padded node rows once: removes the per-iteration row mask from
        # top-K and keeps padded rows of step1 at exactly 0 (no 1e6-scale
        # garbage intermediates).
        if n_real < n_pad:
            row_in_graph = (
                jax.lax.broadcasted_iota(jnp.int32, (gn, 1), 0) % n_pad)
            x_proj = jnp.where(row_in_graph < n_real, x_proj, 0.0)

        # ---- safe L2 row-normalization (rsqrt -> EUP slot) ------------------
        def safe_normalize(t):
            nsq = jnp.sum(t * t, axis=-1, keepdims=True)
            inv = jnp.where(nsq > 0.0, jax.lax.rsqrt(nsq), 1.0)
            return t * inv

        norm_x = safe_normalize(x_proj)        # (G*n_pad, F_pad)
        norm_c = safe_normalize(centers)       # (E_pad,   F_pad)

        # ---- cosine similarities (contract feature dim; no .T materialized) -
        sim = jax.lax.dot_general(
            norm_x, norm_c,
            dimension_numbers=(((1,), (1,)), ((), ())),
            preferred_element_type=jnp.float32)            # (G*n_pad, E_pad)
        sim = jnp.clip(sim, -1.0, 1.0)

        # ---- top-K sparsification -> dense attention matrix H ---------------
        col = jax.lax.broadcasted_iota(jnp.int32, sim.shape, 1)
        # Mask padded hyperedge columns once (never selectable).
        if e_real < e_pad:
            work = jnp.where(col < e_real, sim, _PAD_SENTINEL)
        else:
            work = sim

        H = jnp.zeros_like(sim)
        # Iterative arg-max with exact lowest-index tie-break (matches
        # torch.topk / lax.top_k).  K is tiny -> static unroll.  An exact
        # 32-bit (f32 value, index) pack does not exist, so the two exact XLU
        # reductions per iteration are kept.
        # TODO(synk): when the E axis gets tiled (v7x VMEM), replace with a
        #             streaming per-tile top-K merge.
        for _ in range(k_top):
            row_max = jnp.max(work, axis=1, keepdims=True)
            sel = jnp.min(jnp.where(work == row_max, col, e_pad),
                          axis=1, keepdims=True)
            onehot = col == sel
            H = jnp.where(onehot, sim, H)       # padded rows of sim are 0
            work = jnp.where(onehot, _KNOCK_SENTINEL, work)

        # ---- equivariant diffusion ------------------------------------------
        D_v = jnp.sum(H, axis=1, keepdims=True)              # (G*n_pad, 1)
        D_v_inv_sqrt = 1.0 / (jnp.sqrt(D_v) + 1e-6)
        step1 = x_proj * D_v_inv_sqrt                        # (G*n_pad, F_pad)

        # Split per graph only where the contraction must stay per graph.
        # n_pad % 8 == 0 and E_pad/F_pad % 128 == 0 -> tile-aligned reshapes.
        Hg = H.reshape(g, n_pad, e_pad)
        s1g = step1.reshape(g, n_pad, f_pad)
        D_e = jnp.sum(Hg, axis=1, keepdims=True)             # (G, 1, E_pad)
        D_e_inv = 1.0 / (D_e + 1e-6)

        # step2[g] = H[g]^T @ step1[g]   (contract nodes; batch over graphs)
        # TODO(synk): at large N*E, inspect pl.lower_as_mlir for a hidden XLU
        #             transpose of H here; materialize H^T once if present.
        step2 = jnp.einsum('gne,gnf->gef', Hg, s1g,
                           preferred_element_type=jnp.float32)   # (G,E_pad,F_pad)
        # H @ diag(D_e_inv) @ step2 == (H * D_e_inv) @ step2  (no transpose)
        step4 = jnp.einsum('gne,gef->gnf', Hg * D_e_inv, step2,
                           preferred_element_type=jnp.float32)   # (G,n_pad,F_pad)
        step5 = step4.reshape(gn, f_pad) * D_v_inv_sqrt

        x_hyper = (1.0 - alpha) * x_proj + alpha * step5
        out_ref[...] = (x_proj + x_hyper).astype(out_ref.dtype)

    return kernel


def _vmem_limit_bytes(g, n_pad, fin, f_pad, e_pad):
    """Rough scoped-VMEM request: double-buffered x/out blocks + resident
    params + the large intermediates, with 2x headroom; clamped."""
    f32 = 4
    gn = g * n_pad
    blocks = 2 * gn * (fin + f_pad) * f32
    params = (fin * f_pad + f_pad + 2 * e_pad * f_pad) * f32
    interm = (gn * (3 * e_pad + 4 * f_pad) + (g + 1) * e_pad * f_pad) * f32
    est = 2 * (blocks + params + interm)
    return int(min(max(est, 32 << 20), 100 << 20))


def hypergraph_projection_batched(xb, params, alpha, *, graphs_per_step=None):
    """B independent graphs.  xb: (B, N, Fin); params from prepare_params()."""
    bsz, n, fin = xb.shape
    assert fin == params["fin"]
    n_pad = _round_up(max(n, 1), 8)

    # Fold G graphs per grid step so the MXU sees M = G*n_pad rows and the
    # fixed per-step overhead is amortized.
    if graphs_per_step is None:
        g_max = max(1, _MAX_ROWS_PER_STEP // n_pad)
        steps = max(1, math.ceil(bsz / g_max))
        g = math.ceil(bsz / steps)
    else:
        g = max(1, min(graphs_per_step, bsz))
    steps = math.ceil(bsz / g)
    b_pad = steps * g

    f_pad, e_pad, e_real = params["f_pad"], params["e_pad"], params["e"]
    xp = jnp.asarray(xb, jnp.float32)
    if (b_pad, n_pad) != (bsz, n):                  # guard the hot-path pad
        xp = jnp.pad(xp, ((0, b_pad - bsz), (0, n_pad - n), (0, 0)))
    xp = xp.reshape(b_pad * n_pad, fin)             # flat rows, lane/sublane friendly

    gn = g * n_pad
    kernel = _make_kernel(g, n, n_pad, e_real, e_pad, f_pad, K_TOP)
    out = pl.pallas_call(
        kernel,
        out_shape=jax.ShapeDtypeStruct((b_pad * n_pad, f_pad), jnp.float32),
        grid=(steps,),
        in_specs=[
            pl.BlockSpec((gn, fin), lambda i: (i, 0)),          # x rows for G graphs
            pl.BlockSpec((fin, f_pad), lambda i: (0, 0)),       # w (resident)
            pl.BlockSpec((1, f_pad), lambda i: (0, 0)),         # b
            pl.BlockSpec((e_pad, f_pad), lambda i: (0, 0)),     # centers
            pl.BlockSpec(memory_space=pltpu.MemorySpace.SMEM),  # alpha scalar
        ],
        out_specs=pl.BlockSpec((gn, f_pad), lambda i: (i, 0)),
        compiler_params=pltpu.CompilerParams(
            dimension_semantics=("parallel",),
            vmem_limit_bytes=_vmem_limit_bytes(g, n_pad, fin, f_pad, e_pad)),
    )(xp, params["wp"], params["bp"], params["cp"],
      jnp.asarray(alpha, jnp.float32).reshape(1))

    out = out.reshape(b_pad, n_pad, f_pad)[:bsz, :n, :params["fout"]]
    return out.astype(xb.dtype)


def hypergraph_projection(x, params, alpha):
    """Single graph: x (N, Fin).  Routed through the folded batched kernel.
    TODO(synk): for large single graphs, add an N-tiled pipelined grid and
                E-tiled streaming top-K instead of the batch-of-1 route."""
    return hypergraph_projection_batched(x[None], params, alpha)[0]


def _reference(x, w, b, centers, alpha):
    """Pure-JAX reference reproducing the PyTorch forward."""
    x = x.astype(jnp.float32)
    x_proj = jnp.tanh(x @ w + b[None, :])

    def safe_normalize(t):
        nrm = jnp.linalg.norm(t, axis=1, keepdims=True)
        nrm = jnp.where(nrm > 0, nrm, 1.0)
        return t / nrm

    sim = jnp.clip(safe_normalize(x_proj) @ safe_normalize(centers).T, -1.0, 1.0)
    vals, idxs = jax.lax.top_k(sim, K_TOP)
    H = jnp.zeros_like(sim)
    rows = jnp.repeat(jnp.arange(sim.shape[0]), K_TOP)
    H = H.at[rows, idxs.reshape(-1)].set(vals.reshape(-1))

    D_v = H.sum(axis=1)
    D_v_inv_sqrt = 1.0 / (jnp.sqrt(D_v) + 1e-6)
    D_e = H.sum(axis=0)
    D_e_inv = 1.0 / (D_e + 1e-6)
    step1 = x_proj * D_v_inv_sqrt[:, None]
    step2 = H.T @ step1
    step3 = step2 * D_e_inv[:, None]
    step4 = H @ step3
    step5 = step4 * D_v_inv_sqrt[:, None]
    x_hyper = (1 - alpha) * x_proj + alpha * step5
    return x_proj + x_hyper


if __name__ == "__main__":
    N, FIN, FOUT, NHE, B = 8, 16, 32, 20, 4

    key = jax.random.PRNGKey(0)
    kx, kw, kb, kc, kxb, kx2 = jax.random.split(key, 6)
    x = jax.random.normal(kx, (N, FIN), jnp.float32)
    # nn.Linear(in,out): weight (out,in) -> stored transposed (in,out)
    w = jax.random.normal(kw, (FIN, FOUT), jnp.float32) * 0.1
    b = jax.random.normal(kb, (FOUT,), jnp.float32) * 0.1
    centers = jax.random.normal(kc, (NHE, FOUT), jnp.float32)
    alpha = 0.5

    params = prepare_params(w, b, centers)   # pad params once, outside hot path

    # --- single graph (batch-of-1 route) ---
    out = jax.block_until_ready(hypergraph_projection(x, params, alpha))
    ref = _reference(x, w, b, centers, alpha)
    assert out.shape == (N, FOUT) and out.dtype == jnp.float32
    assert jnp.allclose(out, ref, atol=1e-4, rtol=1e-4), "single-graph mismatch"

    # --- batched: all G=B graphs folded into one grid step ---
    xb = jax.random.normal(kxb, (B, N, FIN), jnp.float32)
    outb = jax.block_until_ready(
        hypergraph_projection_batched(xb, params, alpha))
    refb = jax.vmap(lambda xi: _reference(xi, w, b, centers, alpha))(xb)
    assert outb.shape == (B, N, FOUT) and outb.dtype == jnp.float32
    assert jnp.allclose(outb, refb, atol=1e-4, rtol=1e-4), "batched mismatch"

    # --- grid > 1, padded node rows, padded batch (B2=3 with G=2 -> 2 steps) ---
    N2, B2 = 6, 3
    xb2 = jax.random.normal(kx2, (B2, N2, FIN), jnp.float32)
    outb2 = jax.block_until_ready(
        hypergraph_projection_batched(xb2, params, alpha, graphs_per_step=2))
    refb2 = jax.vmap(lambda xi: _reference(xi, w, b, centers, alpha))(xb2)
    assert outb2.shape == (B2, N2, FOUT)
    assert jnp.allclose(outb2, refb2, atol=1e-4, rtol=1e-4), "padded/multistep mismatch"

    print("KERNEL_OK")
</pallas_src>

<mosaic_0001>
module attributes {stable_mosaic.version = 11 : i64} {
  func.func @kernel(%arg0: i32, %arg1: memref<8x16xf32, #tpu.memory_space<vmem>>, %arg2: memref<16x128xf32, #tpu.memory_space<vmem>>, %arg3: memref<1x128xf32, #tpu.memory_space<vmem>>, %arg4: memref<128x128xf32, #tpu.memory_space<vmem>>, %arg5: memref<1xf32, #tpu.memory_space<smem>>, %arg6: memref<8x128xf32, #tpu.memory_space<vmem>>) attributes {dimension_semantics = [#tpu.dimension_semantics<parallel>], iteration_bounds = array<i64: 1>, scalar_prefetch = 0 : i64, scratch_operands = 0 : i64, tpu.core_type = #tpu.core_type<tc>, window_params = [{transform_indices = @transform_0, window_bounds = array<i64: 8, 16>}, {pipeline_mode = #tpu.pipeline_mode<synchronous>, transform_indices = @transform_1, window_bounds = array<i64: 16, 128>}, {pipeline_mode = #tpu.pipeline_mode<synchronous>, transform_indices = @transform_2, window_bounds = array<i64: 1, 128>}, {pipeline_mode = #tpu.pipeline_mode<synchronous>, transform_indices = @transform_3, window_bounds = array<i64: 128, 128>}, {transform_indices = @transform_4, window_bounds = array<i64: 1>}, {transform_indices = @transform_5, window_bounds = array<i64: 8, 128>}]} {
    %c0 = arith.constant 0 : index
    %0 = memref.load %arg5[%c0] : memref<1xf32, #tpu.memory_space<smem>>
    %c0_0 = arith.constant 0 : index
    %c0_1 = arith.constant 0 : index
    %1 = vector.load %arg1[%c0_0, %c0_1] : memref<8x16xf32, #tpu.memory_space<vmem>>, vector<8x16xf32>
    %c0_2 = arith.constant 0 : index
    %c0_3 = arith.constant 0 : index
    %2 = vector.load %arg2[%c0_2, %c0_3] : memref<16x128xf32, #tpu.memory_space<vmem>>, vector<16x128xf32>
    %c0_4 = arith.constant 0 : index
    %c0_5 = arith.constant 0 : index
    %3 = vector.load %arg3[%c0_4, %c0_5] : memref<1x128xf32, #tpu.memory_space<vmem>>, vector<1x128xf32>
    %c0_6 = arith.constant 0 : index
    %c0_7 = arith.constant 0 : index
    %4 = vector.load %arg4[%c0_6, %c0_7] : memref<128x128xf32, #tpu.memory_space<vmem>>, vector<128x128xf32>
    %cst = arith.constant dense<0.000000e+00> : vector<8x128xf32>
    %5 = tpu.matmul %1, %2, %cst {dimension_numbers = #tpu.dot_dimension_numbers<[1], [0], [0], [1], [0, 0, 1, 1], [], []>} : vector<8x16xf32>, vector<16x128xf32>, vector<8x128xf32> -> vector<8x128xf32>
    %6 = vector.broadcast %3 : vector<1x128xf32> to vector<8x128xf32>
    %7 = arith.addf %5, %6 : vector<8x128xf32>
    %8 = math.tanh %7 : vector<8x128xf32>
    %9 = arith.mulf %8, %8 : vector<8x128xf32>
    %cst_8 = arith.constant dense<0.000000e+00> : vector<8xf32>
    %10 = vector.multi_reduction <add>, %9, %cst_8 [1] : vector<8x128xf32> to vector<8xf32>
    %11 = vector.shape_cast %10 : vector<8xf32> to vector<8x1xf32>
    %cst_9 = arith.constant 0.000000e+00 : f32
    %12 = vector.broadcast %cst_9 : f32 to vector<8x1xf32>
    %13 = arith.cmpf ogt, %11, %12 : vector<8x1xf32>
    %14 = math.rsqrt %11 : vector<8x1xf32>
    %cst_10 = arith.constant 1.000000e+00 : f32
    %15 = vector.broadcast %cst_10 : f32 to vector<8x1xf32>
    %16 = arith.select %13, %14, %15 : vector<8x1xi1>, vector<8x1xf32>
    %17 = vector.broadcast %16 : vector<8x1xf32> to vector<8x128xf32>
    %18 = arith.mulf %8, %17 : vector<8x128xf32>
    %19 = arith.mulf %4, %4 : vector<128x128xf32>
    %cst_11 = arith.constant dense<0.000000e+00> : vector<128xf32>
    %20 = vector.multi_reduction <add>, %19, %cst_11 [1] : vector<128x128xf32> to vector<128xf32>
    %21 = vector.shape_cast %20 : vector<128xf32> to vector<128x1xf32>
    %cst_12 = arith.constant 0.000000e+00 : f32
    %22 = vector.broadcast %cst_12 : f32 to vector<128x1xf32>
    %23 = arith.cmpf ogt, %21, %22 : vector<128x1xf32>
    %24 = math.rsqrt %21 : vector<128x1xf32>
    %cst_13 = arith.constant 1.000000e+00 : f32
    %25 = vector.broadcast %cst_13 : f32 to vector<128x1xf32>
    %26 = arith.select %23, %24, %25 : vector<128x1xi1>, vector<128x1xf32>
    %27 = vector.broadcast %26 : vector<128x1xf32> to vector<128x128xf32>
    %28 = arith.mulf %4, %27 : vector<128x128xf32>
    %cst_14 = arith.constant dense<0.000000e+00> : vector<8x128xf32>
    %29 = tpu.matmul %18, %28, %cst_14 {dimension_numbers = #tpu.dot_dimension_numbers<[1], [1], [0], [0], [0, 0, 1, 0], [], []>} : vector<8x128xf32>, vector<128x128xf32>, vector<8x128xf32> -> vector<8x128xf32>
    %cst_15 = arith.constant -1.000000e+00 : f32
    %cst_16 = arith.constant 1.000000e+00 : f32
    %30 = vector.broadcast %cst_15 : f32 to vector<8x128xf32>
    %31 = arith.maximumf %30, %29 : vector<8x128xf32>
    %32 = vector.broadcast %cst_16 : f32 to vector<8x128xf32>
    %33 = arith.minimumf %32, %31 : vector<8x128xf32>
    %34 = tpu.iota {dimensions = array<i32: 1>} : vector<8x128xi32>
    %c20_i32 = arith.constant 20 : i32
    %35 = vector.broadcast %c20_i32 : i32 to vector<8x128xi32>
    %36 = arith.cmpi slt, %34, %35 : vector<8x128xi32>
    %cst_17 = arith.constant -3.000000e+00 : f32
    %37 = vector.broadcast %cst_17 : f32 to vector<8x128xf32>
    %38 = arith.select %36, %33, %37 : vector<8x128xi1>, vector<8x128xf32>
    %cst_18 = arith.constant 0.000000e+00 : f32
    %39 = vector.broadcast %cst_18 : f32 to vector<8x128xf32>
    %cst_19 = arith.constant dense<0xFF800000> : vector<8xf32>
    %40 = vector.multi_reduction <maximumf>, %38, %cst_19 [1] : vector<8x128xf32> to vector<8xf32>
    %41 = vector.shape_cast %40 : vector<8xf32> to vector<8x1xf32>
    %42 = vector.broadcast %41 : vector<8x1xf32> to vector<8x128xf32>
    %43 = arith.cmpf oeq, %38, %42 : vector<8x128xf32>
    %c128_i32 = arith.constant 128 : i32
    %44 = vector.broadcast %c128_i32 : i32 to vector<8x128xi32>
    %45 = arith.select %43, %34, %44 : vector<8x128xi1>, vector<8x128xi32>
    %cst_20 = arith.constant dense<2147483647> : vector<8xi32>
    %46 = vector.multi_reduction <minsi>, %45, %cst_20 [1] : vector<8x128xi32> to vector<8xi32>
    %47 = vector.shape_cast %46 : vector<8xi32> to vector<8x1xi32>
    %48 = vector.broadcast %47 : vector<8x1xi32> to vector<8x128xi32>
    %49 = arith.cmpi eq, %34, %48 : vector<8x128xi32>
    %50 = arith.select %49, %33, %39 : vector<8x128xi1>, vector<8x128xf32>
    %cst_21 = arith.constant -2.000000e+00 : f32
    %51 = vector.broadcast %cst_21 : f32 to vector<8x128xf32>
    %52 = arith.select %49, %51, %38 : vector<8x128xi1>, vector<8x128xf32>
    %cst_22 = arith.constant dense<0xFF800000> : vector<8xf32>
    %53 = vector.multi_reduction <maximumf>, %52, %cst_22 [1] : vector<8x128xf32> to vector<8xf32>
    %54 = vector.shape_cast %53 : vector<8xf32> to vector<8x1xf32>
    %55 = vector.broadcast %54 : vector<8x1xf32> to vector<8x128xf32>
    %56 = arith.cmpf oeq, %52, %55 : vector<8x128xf32>
    %c128_i32_23 = arith.constant 128 : i32
    %57 = vector.broadcast %c128_i32_23 : i32 to vector<8x128xi32>
    %58 = arith.select %56, %34, %57 : vector<8x128xi1>, vector<8x128xi32>
    %cst_24 = arith.constant dense<2147483647> : vector<8xi32>
    %59 = vector.multi_reduction <minsi>, %58, %cst_24 [1] : vector<8x128xi32> to vector<8xi32>
    %60 = vector.shape_cast %59 : vector<8xi32> to vector<8x1xi32>
    %61 = vector.broadcast %60 : vector<8x1xi32> to vector<8x128xi32>
    %62 = arith.cmpi eq, %34, %61 : vector<8x128xi32>
    %63 = arith.select %62, %33, %50 : vector<8x128xi1>, vector<8x128xf32>
    %cst_25 = arith.constant -2.000000e+00 : f32
    %64 = vector.broadcast %cst_25 : f32 to vector<8x128xf32>
    %65 = arith.select %62, %64, %52 : vector<8x128xi1>, vector<8x128xf32>
    %cst_26 = arith.constant dense<0xFF800000> : vector<8xf32>
    %66 = vector.multi_reduction <maximumf>, %65, %cst_26 [1] : vector<8x128xf32> to vector<8xf32>
    %67 = vector.shape_cast %66 : vector<8xf32> to vector<8x1xf32>
    %68 = vector.broadcast %67 : vector<8x1xf32> to vector<8x128xf32>
    %69 = arith.cmpf oeq, %65, %68 : vector<8x128xf32>
    %c128_i32_27 = arith.constant 128 : i32
    %70 = vector.broadcast %c128_i32_27 : i32 to vector<8x128xi32>
    %71 = arith.select %69, %34, %70 : vector<8x128xi1>, vector<8x128xi32>
    %cst_28 = arith.constant dense<2147483647> : vector<8xi32>
    %72 = vector.multi_reduction <minsi>, %71, %cst_28 [1] : vector<8x128xi32> to vector<8xi32>
    %73 = vector.shape_cast %72 : vector<8xi32> to vector<8x1xi32>
    %74 = vector.broadcast %73 : vector<8x1xi32> to vector<8x128xi32>
    %75 = arith.cmpi eq, %34, %74 : vector<8x128xi32>
    %76 = arith.select %75, %33, %63 : vector<8x128xi1>, vector<8x128xf32>
    %cst_29 = arith.constant -2.000000e+00 : f32
    %77 = vector.broadcast %cst_29 : f32 to vector<8x128xf32>
    %78 = arith.select %75, %77, %65 : vector<8x128xi1>, vector<8x128xf32>
    %cst_30 = arith.constant dense<0xFF800000> : vector<8xf32>
    %79 = vector.multi_reduction <maximumf>, %78, %cst_30 [1] : vector<8x128xf32> to vector<8xf32>
    %80 = vector.shape_cast %79 : vector<8xf32> to vector<8x1xf32>
    %81 = vector.broadcast %80 : vector<8x1xf32> to vector<8x128xf32>
    %82 = arith.cmpf oeq, %78, %81 : vector<8x128xf32>
    %c128_i32_31 = arith.constant 128 : i32
    %83 = vector.broadcast %c128_i32_31 : i32 to vector<8x128xi32>
    %84 = arith.select %82, %34, %83 : vector<8x128xi1>, vector<8x128xi32>
    %cst_32 = arith.constant dense<2147483647> : vector<8xi32>
    %85 = vector.multi_reduction <minsi>, %84, %cst_32 [1] : vector<8x128xi32> to vector<8xi32>
    %86 = vector.shape_cast %85 : vector<8xi32> to vector<8x1xi32>
    %87 = vector.broadcast %86 : vector<8x1xi32> to vector<8x128xi32>
    %88 = arith.cmpi eq, %34, %87 : vector<8x128xi32>
    %89 = arith.select %88, %33, %76 : vector<8x128xi1>, vector<8x128xf32>
    %cst_33 = arith.constant -2.000000e+00 : f32
    %90 = vector.broadcast %cst_33 : f32 to vector<8x128xf32>
    %91 = arith.select %88, %90, %78 : vector<8x128xi1>, vector<8x128xf32>
    %cst_34 = arith.constant dense<0xFF800000> : vector<8xf32>
    %92 = vector.multi_reduction <maximumf>, %91, %cst_34 [1] : vector<8x128xf32> to vector<8xf32>
    %93 = vector.shape_cast %92 : vector<8xf32> to vector<8x1xf32>
    %94 = vector.broadcast %93 : vector<8x1xf32> to vector<8x128xf32>
    %95 = arith.cmpf oeq, %91, %94 : vector<8x128xf32>
    %c128_i32_35 = arith.constant 128 : i32
    %96 = vector.broadcast %c128_i32_35 : i32 to vector<8x128xi32>
    %97 = arith.select %95, %34, %96 : vector<8x128xi1>, vector<8x128xi32>
    %cst_36 = arith.constant dense<2147483647> : vector<8xi32>
    %98 = vector.multi_reduction <minsi>, %97, %cst_36 [1] : vector<8x128xi32> to vector<8xi32>
    %99 = vector.shape_cast %98 : vector<8xi32> to vector<8x1xi32>
    %100 = vector.broadcast %99 : vector<8x1xi32> to vector<8x128xi32>
    %101 = arith.cmpi eq, %34, %100 : vector<8x128xi32>
    %102 = arith.select %101, %33, %89 : vector<8x128xi1>, vector<8x128xf32>
    %cst_37 = arith.constant dense<0.000000e+00> : vector<8xf32>
    %103 = vector.multi_reduction <add>, %102, %cst_37 [1] : vector<8x128xf32> to vector<8xf32>
    %104 = vector.shape_cast %103 : vector<8xf32> to vector<8x1xf32>
    %105 = math.sqrt %104 : vector<8x1xf32>
    %cst_38 = arith.constant 9.99999997E-7 : f32
    %106 = vector.broadcast %cst_38 : f32 to vector<8x1xf32>
    %107 = arith.addf %105, %106 : vector<8x1xf32>
    %cst_39 = arith.constant 1.000000e+00 : f32
    %108 = vector.broadcast %cst_39 : f32 to vector<8x1xf32>
    %109 = arith.divf %108, %107 : vector<8x1xf32>
    %110 = vector.broadcast %109 : vector<8x1xf32> to vector<8x128xf32>
    %111 = arith.mulf %8, %110 : vector<8x128xf32>
    %112 = vector.shape_cast %102 : vector<8x128xf32> to vector<1x8x128xf32>
    %113 = vector.shape_cast %111 : vector<8x128xf32> to vector<1x8x128xf32>
    %cst_40 = arith.constant dense<0.000000e+00> : vector<1x128xf32>
    %114 = vector.multi_reduction <add>, %112, %cst_40 [1] : vector<1x8x128xf32> to vector<1x128xf32>
    %115 = vector.shape_cast %114 : vector<1x128xf32> to vector<1x1x128xf32>
    %cst_41 = arith.constant 9.99999997E-7 : f32
    %116 = vector.broadcast %cst_41 : f32 to vector<1x1x128xf32>
    %117 = arith.addf %115, %116 : vector<1x1x128xf32>
    %cst_42 = arith.constant 1.000000e+00 : f32
    %118 = vector.broadcast %cst_42 : f32 to vector<1x1x128xf32>
    %119 = arith.divf %118, %117 : vector<1x1x128xf32>
    "tpu.trace_start"() <{level = 10 : i32, message = "gne,gnf->gef"}> : () -> ()
    %cst_43 = arith.constant dense<0.000000e+00> : vector<1x128x128xf32>
    %120 = tpu.matmul %112, %113, %cst_43 {dimension_numbers = #tpu.dot_dimension_numbers<[1], [1], [2], [2], [0, 0, 0, 2, 1, 2], [0], [0]>} : vector<1x8x128xf32>, vector<1x8x128xf32>, vector<1x128x128xf32> -> vector<1x128x128xf32>
    "tpu.trace_stop"() : () -> ()
    %121 = vector.broadcast %119 : vector<1x1x128xf32> to vector<1x8x128xf32>
    %122 = arith.mulf %112, %121 : vector<1x8x128xf32>
    "tpu.trace_start"() <{level = 10 : i32, message = "gne,gef->gnf"}> : () -> ()
    %cst_44 = arith.constant dense<0.000000e+00> : vector<1x8x128xf32>
    %123 = tpu.matmul %122, %120, %cst_44 {dimension_numbers = #tpu.dot_dimension_numbers<[2], [1], [1], [2], [0, 0, 0, 1, 1, 2], [0], [0]>} : vector<1x8x128xf32>, vector<1x128x128xf32>, vector<1x8x128xf32> -> vector<1x8x128xf32>
    "tpu.trace_stop"() : () -> ()
    %124 = vector.shape_cast %123 : vector<1x8x128xf32> to vector<8x128xf32>
    %125 = vector.broadcast %109 : vector<8x1xf32> to vector<8x128xf32>
    %126 = arith.mulf %124, %125 : vector<8x128xf32>
    %cst_45 = arith.constant 1.000000e+00 : f32
    %127 = arith.subf %cst_45, %0 : f32
    %128 = vector.broadcast %127 : f32 to vector<8x128xf32>
    %129 = arith.mulf %128, %8 : vector<8x128xf32>
    %130 = vector.broadcast %0 : f32 to vector<8x128xf32>
    %131 = arith.mulf %130, %126 : vector<8x128xf32>
    %132 = arith.addf %129, %131 : vector<8x128xf32>
    %133 = arith.addf %8, %132 : vector<8x128xf32>
    %c0_46 = arith.constant 0 : index
    %c0_47 = arith.constant 0 : index
    %134 = vector.load %arg6[%c0_46, %c0_47] : memref<8x128xf32, #tpu.memory_space<vmem>>, vector<8x128xf32>
    tpu.vector_store %arg6[%c0_46, %c0_47], %133 {strides = array<i32>} : memref<8x128xf32, #tpu.memory_space<vmem>>, vector<8x128xf32>,
    return
  }
  func.func @transform_0(%arg0: i32) -> (i32, i32) {
    %c0_i32 = arith.constant 0 : i32
    %c0_i32_0 = arith.constant 0 : i32
    return %arg0, %c0_i32 : i32, i32
  }
  func.func @transform_1(%arg0: i32) -> (i32, i32) {
    %c0_i32 = arith.constant 0 : i32
    %c0_i32_0 = arith.constant 0 : i32
    %c0_i32_1 = arith.constant 0 : i32
    return %c0_i32, %c0_i32_0 : i32, i32
  }
  func.func @transform_2(%arg0: i32) -> (i32, i32) {
    %c0_i32 = arith.constant 0 : i32
    %c0_i32_0 = arith.constant 0 : i32
    %c0_i32_1 = arith.constant 0 : i32
    return %c0_i32, %c0_i32_0 : i32, i32
  }
  func.func @transform_3(%arg0: i32) -> (i32, i32) {
    %c0_i32 = arith.constant 0 : i32
    %c0_i32_0 = arith.constant 0 : i32
    %c0_i32_1 = arith.constant 0 : i32
    return %c0_i32, %c0_i32_0 : i32, i32
  }
  func.func @transform_4(%arg0: i32) -> i32 {
    %c0_i32 = arith.constant 0 : i32
    %c0_i32_0 = arith.constant 0 : i32
    return %c0_i32 : i32
  }
  func.func @transform_5(%arg0: i32) -> (i32, i32) {
    %c0_i32 = arith.constant 0 : i32
    %c0_i32_0 = arith.constant 0 : i32
    return %arg0, %c0_i32 : i32, i32
  }
}

</mosaic_0001>

<bundles_post_ra>
// kernel: tpu_custom_call.1
= control target key start
LH: loop header
LB: loop body
LE: loop exit
PB: predicated region body
PF: predicated region fallthrough
CT: control target
= control target key end

     0   :  { %11 = vsyncpa [#allocation4], 0  ;;  %s1443_s0 = inlined_call_operand.hbm [shape: f32[8,16], index: 0, kind: input, shape index: {}]   ;;  %s1444_s1 = inlined_call_operand.hbm [shape: f32[16,128], index: 1, kind: input, shape index: {}]   ;;  %s1445_s2 = inlined_call_operand.vmem [shape: f32[1,128], index: 2, kind: input, shape index: {}]   ;;  %s1446_s3 = inlined_call_operand.hbm [shape: f32[128,128], index: 3, kind: input, shape index: {}]   ;;  %s1447_s4 = inlined_call_operand.<no memory space> [shape: f32[1], index: 4, kind: input, shape index: {}]   ;;  %s1448_s5 = inlined_call_operand.hbm [shape: f32[8,128], index: 5, kind: output, shape index: {}]  }
   0x1   :  { %12 = vsyncpa [#allocation7], 0 }
   0x2   :  { %13 = vsyncpa [#allocation5], 0  ;;  %s1178_s18 = smov [#allocation6]   ;;  %s1084_s22 = scalar_lea.hbm %s1444_s1, 256 }
   0x3   :  { %s29_s19 = sshll.u32 %s1178_s18, 4  ;;  %p1085_p0 = scmp.ne.s32.totalorder %s1444_s1, %s1084_s22  ;;  %s30_s19 = int_to_ptr.vmem [resolvable:$true] %s29_s19 }
   0x4   :  { %p1088_p1 = scmp.lt.u32.totalorder %s1084_s22, %s1444_s1 }
   0x6   :  { %p1090_p2 = pnand %p1088_p1, %p1085_p0 }
   0x8   :  { %1093 = shalt.err (!%p1090_p2)
}
   0x9   :  { %s1094_s27 = scalar_lea.vmem %s30_s19, 256  ;;  %p1099_p4 = scmp.lt.s32.totalorder %s30_s19, %s30_s19 }
   0xa   :  { %p1095_p3 = scmp.ne.s32.totalorder %s30_s19, %s1094_s27  ;;  %p1100_p5 = scmp.lt.s32.totalorder %s1094_s27, %s1094_s27 }
   0xc   :  { %p1101_p6 = por %p1100_p5, %p1099_p4 }
   0xe   :  { %p1102_p7 = pnand %p1101_p6, %p1095_p3 }
  0x10   :  { %1105 = shalt.err (!%p1102_p7)
}
  0x11   :  { %s1179_s28 = smov 128   ;;  %s1180_s29 = smov 8  }
  0x12   :  { %35 = dma.hbm_to_vmem [thread:$0]  %s1444_s1, 256, %s30_s19, [#allocation7], %s1179_s28, %s1179_s28, %s1180_s29  }
  0x13   :  { %s1181_s7 = smov [#allocation3]   ;;  %s1182_s9 = smov [#allocation8]  }
  0x14   :  { %s20_s8 = sshll.u32 %s1181_s7, 4  ;;  %s43_s10 = sshll.u32 %s1182_s9, 4  ;;  %s21_s8 = int_to_ptr.vmem [resolvable:$true] %s20_s8  ;;  %s44_s10 = int_to_ptr.vmem [resolvable:$true] %s43_s10 }
  0x15   :  { %s1106_s13 = scalar_lea.hbm %s1443_s0, 128 }
  0x16   :  { %p1107_p8 = scmp.ne.s32.totalorder %s1443_s0, %s1106_s13  ;;  %p1110_p9 = scmp.lt.u32.totalorder %s1106_s13, %s1443_s0 }
  0x18   :  { %p1112_p10 = pnand %p1110_p9, %p1107_p8 }
  0x1a   :  { %1115 = shalt.err (!%p1112_p10)
}
  0x1b   :  { %s1116_s1 = scalar_lea.vmem %s21_s8, 128  ;;  %p1121_p12 = scmp.lt.s32.totalorder %s21_s8, %s21_s8 }
  0x1c   :  { %p1117_p11 = scmp.ne.s32.totalorder %s21_s8, %s1116_s1  ;;  %p1122_p13 = scmp.lt.s32.totalorder %s1116_s1, %s1116_s1 }
  0x1e   :  { %p1123_p0 = por %p1122_p13, %p1121_p12 }
  0x20   :  { %p1124_p1 = pnand %p1123_p0, %p1117_p11 }
  0x22   :  { %1127 = shalt.err (!%p1124_p1)
}
  0x23   :  { %23 = dma.hbm_to_vmem [thread:$0]  %s1443_s0, 128, %s21_s8, [#allocation4]  }
  0x24   :  { %s1128_s22 = scalar_lea.hbm %s1446_s3, 2048 }
  0x25   :  { %p1129_p2 = scmp.ne.s32.totalorder %s1446_s3, %s1128_s22  ;;  %p1132_p3 = scmp.lt.u32.totalorder %s1128_s22, %s1446_s3 }
  0x27   :  { %p1134_p4 = pnand %p1132_p3, %p1129_p2 }
  0x29   :  { %1137 = shalt.err (!%p1134_p4)
}
  0x2a   :  { %s1138_s27 = scalar_lea.vmem %s44_s10, 2048  ;;  %p1143_p6 = scmp.lt.s32.totalorder %s44_s10, %s44_s10 }
  0x2b   :  { %p1139_p5 = scmp.ne.s32.totalorder %s44_s10, %s1138_s27  ;;  %p1144_p7 = scmp.lt.s32.totalorder %s1138_s27, %s1138_s27 }
  0x2d   :  { %p1145_p8 = por %p1144_p7, %p1143_p6 }
  0x2f   :  { %p1146_p9 = pnand %p1145_p8, %p1139_p5 }
  0x31   :  { %1149 = shalt.err (!%p1146_p9)
}
  0x32   :  { %49 = dma.hbm_to_vmem [thread:$0]  %s1446_s3, 2048, %s44_s10, [#allocation7], %s1179_s28, %s1179_s28, %s1180_s29  }
  0x33   :  { %1172 = dma.done.wait [#allocation4], 128  }
  0x34   :  { %1173 = vsyncadd [#allocation4], 4294967168 }
  0x35   :  { %1174 = dma.done.wait [#allocation7], 2304  }
  0x36   :  { %1175 = vsyncadd [#allocation7], 4294964992  ;;  %v1183_v0 = vmov 0.0|0.0   ;;  %vm1184_vm0 = vmmov 0   ;;  %v1185_v1 = vmov 0.0   ;;  %v63_v2 = vld [vmem:[#allocation6] sm:$0xff] }
  0x37   :  { %982 = vmatprep.subr.bf16.mxu0 %v1183_v0  ;;  %883 = vmatprep.mubr.msk.f32.mxu0 %vm1184_vm0, %v1185_v1  ;;  %v64_v3 = vld [vmem:[#allocation6 + $0x8] sm:$0xff]  ;;  %v1265_v5 = vld [vmem:[#allocation8] sm:$0xff]  ;;  %v1267_v6 = vld [vmem:[#allocation8 + $0x8] sm:$0xff]  ;;  %vm88_vm1 = vcmask 130048   ;;  %s782_s6 = ssub.f32 1.0, %s1447_s4  ;;  %s1186_s9 = smov [#allocation9]  }
  0x38   :  { %985 = vmatprep.subr.bf16.mxu1 %v1183_v0  ;;  %918 = vmatprep.mubr.msk.f32.mxu1 %vm1184_vm0, %v1185_v1  ;;  %v983_v4 = vpack.c.bf16 %v64_v3, %v63_v2  ;;  %v1269_v7 = vld [vmem:[#allocation8 + $0x10] sm:$0xff]  ;;  %v170_v8 = vmul.f32 %v1265_v5, %v1265_v5  ;;  %v1275_v10 = vld [vmem:[#allocation8 + $0x18] sm:$0xff]  ;;  %v62_v11 = vld [vmem:[#allocation3] sm:$0xff]  ;;  %v171_v12 = vmul.f32 %v1267_v6, %v1267_v6  ;;  %s796_s10 = sshll.u32 %s1186_s9, 4  ;;  %s797_s10 = int_to_ptr.vmem [resolvable:$true] %s796_s10 }
  0x39   :  { %v172_v9 = vmul.f32 %v1269_v7, %v1269_v7  ;;  %v173_v13 = vmul.f32 %v1275_v10, %v1275_v10  ;;  %v1281_v14 = vld [vmem:[#allocation8 + $0x28] sm:$0xff]  ;;  %v1283_v15 = vld [vmem:[#allocation8 + $0x20] sm:$0xff]  ;;  %v1289_v18 = vld [vmem:[#allocation8 + $0x38] sm:$0xff]  ;;  %s1150_s11 = scalar_lea.vmem %s797_s10, 128  ;;  %p1155_p11 = scmp.lt.s32.totalorder %s797_s10, %s797_s10 }
  0x3a   :  { %984 = vmatpush3.bf16.msra.mxu0 %v983_v4  ;;  %186 = vadd.xlane.f32.xlu0 %v170_v8  ;;  %v175_v16 = vmul.f32 %v1281_v14, %v1281_v14  ;;  %v174_v17 = vmul.f32 %v1283_v15, %v1283_v15  ;;  %v1291_v19 = vld [vmem:[#allocation8 + $0x30] sm:$0xff]  ;;  %v177_v20 = vmul.f32 %v1289_v18, %v1289_v18  ;;  %v1297_v22 = vld [vmem:[#allocation8 + $0x48] sm:$0xff]  ;;  %v1299_v23 = vld [vmem:[#allocation8 + $0x40] sm:$0xff]  ;;  %p1151_p10 = scmp.ne.s32.totalorder %s797_s10, %s1150_s11  ;;  %p1156_p12 = scmp.lt.s32.totalorder %s1150_s11, %s1150_s11 }
  0x3b   :  { %190 = vadd.xlane.f32.xlu1 %v172_v9  ;;  %v176_v21 = vmul.f32 %v1291_v19, %v1291_v19  ;;  %v179_v24 = vmul.f32 %v1297_v22, %v1297_v22  ;;  %v178_v25 = vmul.f32 %v1299_v23, %v1299_v23  ;;  %v1305_v26 = vld [vmem:[#allocation8 + $0x58] sm:$0xff]  ;;  %v1307_v27 = vld [vmem:[#allocation8 + $0x50] sm:$0xff]  ;;  %v1313_v30 = vld [vmem:[#allocation8 + $0x68] sm:$0xff] }
  0x3c   :  { %v181_v28 = vmul.f32 %v1305_v26, %v1305_v26  ;;  %v180_v29 = vmul.f32 %v1307_v27, %v1307_v27  ;;  %v1315_v31 = vld [vmem:[#allocation8 + $0x60] sm:$0xff]  ;;  %v183_v32 = vmul.f32 %v1313_v30, %v1313_v30  ;;  %v1321_v34 = vld [vmem:[#allocation8 + $0x78] sm:$0xff]  ;;  %v1323_v35 = vld [vmem:[#allocation8 + $0x70] sm:$0xff]  ;;  %p1157_p13 = por %p1156_p12, %p1155_p11 }
  0x3d   :  { %884 = vmatmul.mubr.msk.f32.vlgmr.msra.gmra.mrb[0].mxu0 %vm88_vm1, %v62_v11  ;;  %v182_v33 = vmul.f32 %v1315_v31, %v1315_v31  ;;  %v185_v36 = vmul.f32 %v1321_v34, %v1321_v34  ;;  %v184_v37 = vmul.f32 %v1323_v35, %v1323_v35 }
  0x3e   :  { %188 = vadd.xlane.f32.xlu0 %v171_v12  ;;  %p1158_p0 = pnand %p1157_p13, %p1151_p10 }
  0x3f   :  { %192 = vadd.xlane.f32.xlu1 %v173_v13 }
  0x42   :  { %194 = vadd.xlane.f32.xlu0 %v174_v17 }
  0x43   :  { %196 = vadd.xlane.f32.xlu1 %v175_v16 }
  0x46   :  { %198 = vadd.xlane.f32.xlu0 %v176_v21 }
  0x47   :  { %200 = vadd.xlane.f32.xlu1 %v177_v20 }
  0x4a   :  { %202 = vadd.xlane.f32.xlu0 %v178_v25 }
  0x4b   :  { %204 = vadd.xlane.f32.xlu1 %v179_v24 }
  0x4e   :  { %206 = vadd.xlane.f32.xlu0 %v180_v29 }
  0x4f   :  { %208 = vadd.xlane.f32.xlu1 %v181_v28 }
  0x52   :  { %210 = vadd.xlane.f32.xlu0 %v182_v33 }
  0x53   :  { %212 = vadd.xlane.f32.xlu1 %v183_v32 }
  0x56   :  { %214 = vadd.xlane.f32.xlu0 %v184_v37 }
  0x57   :  { %216 = vadd.xlane.f32.xlu1 %v185_v36 }
  0xc7   :  { %v187_v38 = vpop.xlane.xlu0 %186 }
  0xc8   :  { %v191_v39 = vpop.xlane.xlu1 %190  ;;  %1042 = vrsqrt.f32 %v187_v38  ;;  %vm218_vm2 = vcmp.gt.f32.partialorder %v187_v38, 0.0 }
  0xc9   :  { %1044 = vrsqrt.f32 %v191_v39  ;;  %vm220_vm4 = vcmp.gt.f32.partialorder %v191_v39, 0.0 }
  0xcb   :  { %v189_v40 = vpop.xlane.xlu0 %188 }
  0xcc   :  { %v193_v41 = vpop.xlane.xlu1 %192  ;;  %1046 = vrsqrt.f32 %v189_v40  ;;  %vm219_vm3 = vcmp.gt.f32.partialorder %v189_v40, 0.0 }
  0xcd   :  { %1048 = vrsqrt.f32 %v193_v41  ;;  %vm221_vm5 = vcmp.gt.f32.partialorder %v193_v41, 0.0 }
  0xcf   :  { %v195_v43 = vpop.xlane.xlu0 %194 }
  0xd0   :  { %v197_v42 = vpop.xlane.xlu1 %196  ;;  %vm222_vm7 = vcmp.gt.f32.partialorder %v195_v43, 0.0 }
  0xd1   :  { %1050 = vrsqrt.f32 %v197_v42  ;;  %vm223_vm6 = vcmp.gt.f32.partialorder %v197_v42, 0.0 }
  0xd2   :  { %v1043_v44 = vpop.eup %1042  ;;  %1052 = vrsqrt.f32 %v195_v43 }
  0xd3   :  { %v250_v45 = vsel %vm218_vm2, %v1043_v44, 1.0  ;;  %v1045_v46 = vpop.eup %1044  ;;  %v199_v55 = vpop.xlane.xlu0 %198 }
  0xd4   :  { %v266_v48 = vmul.f32 %v250_v45, %v1265_v5  ;;  %v201_v52 = vpop.xlane.xlu1 %200  ;;  %v252_v53 = vsel %vm220_vm4, %v1045_v46, 1.0  ;;  %vm224_vm9 = vcmp.gt.f32.partialorder %v199_v55, 0.0 }
  0xd5   :  { %1054 = vrsqrt.f32 %v201_v52  ;;  %v268_v57 = vmul.f32 %v252_v53, %v1269_v7  ;;  %vm225_vm8 = vcmp.gt.f32.partialorder %v201_v52, 0.0 }
  0xd6   :  { %v1047_v47 = vpop.eup %1046  ;;  %1056 = vrsqrt.f32 %v199_v55 }
  0xd7   :  { %v1049_v49 = vpop.eup %1048  ;;  %v251_v50 = vsel %vm219_vm3, %v1047_v47, 1.0  ;;  %v203_v3 = vpop.xlane.xlu0 %202 }
  0xd8   :  { %v267_v51 = vmul.f32 %v251_v50, %v1267_v6  ;;  %v253_v54 = vsel %vm221_vm5, %v1049_v49, 1.0  ;;  %v205_v62 = vpop.xlane.xlu1 %204  ;;  %vm226_vm11 = vcmp.gt.f32.partialorder %v203_v3, 0.0 }
  0xd9   :  { %v269_v58 = vmul.f32 %v253_v54, %v1275_v10  ;;  %1058 = vrsqrt.f32 %v205_v62  ;;  %vm227_vm10 = vcmp.gt.f32.partialorder %v205_v62, 0.0 }
  0xda   :  { %v986_v56 = vpack.c.bf16 %v267_v51, %v266_v48  ;;  %1060 = vrsqrt.f32 %v203_v3 }
  0xdb   :  { %v1051_v59 = vpop.eup %1050  ;;  %v989_v61 = vpack.c.bf16 %v269_v58, %v268_v57  ;;  %v207_v12 = vpop.xlane.xlu0 %206  ;;  %v354_v58 = vlaneseq }
  0xdc   :  { %987 = vmatpush3.bf16.xpose.msra.mxu1 %v986_v56  ;;  %v1053_v60 = vpop.eup %1052  ;;  %v255_v63 = vsel %vm223_vm6, %v1051_v59, 1.0  ;;  %v209_v9 = vpop.xlane.xlu1 %208  ;;  %vm228_vm13 = vcmp.gt.f32.partialorder %v207_v12, 0.0 }
  0xdd   :  { %988 = vmatprep.subr.bf16.mxu1 %v1183_v0  ;;  %v254_v2 = vsel %vm222_vm7, %v1053_v60, 1.0  ;;  %v271_v4 = vmul.f32 %v255_v63, %v1281_v14  ;;  %1062 = vrsqrt.f32 %v209_v9  ;;  %vm229_vm12 = vcmp.gt.f32.partialorder %v209_v9, 0.0 }
  0xde   :  { %v270_v5 = vmul.f32 %v254_v2, %v1283_v15  ;;  %1064 = vrsqrt.f32 %v207_v12  ;;  %v1360_v59 = vand.u32 127, %v354_v58 }
  0xdf   :  { %v1055_v6 = vpop.eup %1054  ;;  %v211_v25 = vpop.xlane.xlu0 %210 }
  0xe0   :  { %v1057_v7 = vpop.eup %1056  ;;  %v992_v8 = vpack.c.bf16 %v271_v4, %v270_v5  ;;  %v257_v10 = vsel %vm225_vm8, %v1055_v6, 1.0  ;;  %v213_v20 = vpop.xlane.xlu1 %212  ;;  %vm230_vm15 = vcmp.gt.f32.partialorder %v211_v25, 0.0  ;;  %vm356_vm4 = vcmp.lt.s32.totalorder %v1360_v59, 20 }
  0xe1   :  { %v256_v11 = vsel %vm224_vm9, %v1057_v7, 1.0  ;;  %v273_v13 = vmul.f32 %v257_v10, %v1289_v18  ;;  %1066 = vrsqrt.f32 %v213_v20  ;;  %vm231_vm14 = vcmp.gt.f32.partialorder %v213_v20, 0.0 }
  0xe2   :  { %v272_v14 = vmul.f32 %v256_v11, %v1291_v19  ;;  %1068 = vrsqrt.f32 %v211_v25 }
  0xe3   :  { %v1059_v15 = vpop.eup %1058  ;;  %v215_v38 = vpop.xlane.xlu0 %214 }
  0xe4   :  { %990 = vmatpush3.bf16.xpose.msra.mxu1 %v989_v61  ;;  %v1061_v16 = vpop.eup %1060  ;;  %v995_v17 = vpack.c.bf16 %v273_v13, %v272_v14  ;;  %v259_v21 = vsel %vm227_vm10, %v1059_v15, 1.0  ;;  %v217_v33 = vpop.xlane.xlu1 %216  ;;  %vm232_vm2 = vcmp.gt.f32.partialorder %v215_v38, 0.0 }
  0xe5   :  { %991 = vmatprep.subr.bf16.mxu1 %v1183_v0  ;;  %v258_v24 = vsel %vm226_vm11, %v1061_v16, 1.0  ;;  %v275_v28 = vmul.f32 %v259_v21, %v1297_v22  ;;  %1070 = vrsqrt.f32 %v217_v33  ;;  %vm233_vm1 = vcmp.gt.f32.partialorder %v217_v33, 0.0 }
  0xe6   :  { %v274_v18 = vmul.f32 %v258_v24, %v1299_v23  ;;  %1072 = vrsqrt.f32 %v215_v38 }
  0xe7   :  { %v1063_v19 = vpop.eup %1062 }
  0xe8   :  { %v1065_v29 = vpop.eup %1064  ;;  %v998_v32 = vpack.c.bf16 %v275_v28, %v274_v18  ;;  %v261_v36 = vsel %vm229_vm12, %v1063_v19, 1.0 }
  0xe9   :  { %v260_v37 = vsel %vm228_vm13, %v1065_v29, 1.0  ;;  %v277_v39 = vmul.f32 %v261_v36, %v1305_v26 }
  0xea   :  { %v276_v22 = vmul.f32 %v260_v37, %v1307_v27 }
  0xeb   :  { %v1067_v23 = vpop.eup %1066 }
  0xec   :  { %993 = vmatpush3.bf16.xpose.msra.mxu1 %v992_v8  ;;  %v1069_v40 = vpop.eup %1068  ;;  %v1001_v41 = vpack.c.bf16 %v277_v39, %v276_v22  ;;  %v263_v42 = vsel %vm231_vm14, %v1067_v23, 1.0 }
  0xed   :  { %994 = vmatprep.subr.bf16.mxu1 %v1183_v0  ;;  %v262_v43 = vsel %vm230_vm15, %v1069_v40, 1.0  ;;  %v279_v44 = vmul.f32 %v263_v42, %v1313_v30  ;;  %v806_v30 = vld [vmem:[%s1445_s2] ss:$0 sm:$0xff] }
  0xee   :  { %v278_v45 = vmul.f32 %v262_v43, %v1315_v31 }
  0xef   :  { %v1071_v46 = vpop.eup %1070 }
  0xf0   :  { %v1073_v26 = vpop.eup %1072  ;;  %v1004_v27 = vpack.c.bf16 %v279_v44, %v278_v45  ;;  %v265_v47 = vsel %vm233_vm1, %v1071_v46, 1.0 }
  0xf1   :  { %v264_v48 = vsel %vm232_vm2, %v1073_v26, 1.0  ;;  %v281_v49 = vmul.f32 %v265_v47, %v1321_v34 }
  0xf2   :  { %v280_v50 = vmul.f32 %v264_v48, %v1323_v35 }
  0xf4   :  { %996 = vmatpush3.bf16.xpose.msra.mxu1 %v995_v17  ;;  %v1007_v53 = vpack.c.bf16 %v281_v49, %v280_v50 }
  0xf5   :  { %997 = vmatprep.subr.bf16.mxu1 %v1183_v0 }
  0xfc   :  { %999 = vmatpush3.bf16.xpose.msra.mxu1 %v998_v32 }
  0xfd   :  { %1000 = vmatprep.subr.bf16.mxu1 %v1183_v0 }
 0x104   :  { %1002 = vmatpush3.bf16.xpose.msra.mxu1 %v1001_v41 }
 0x105   :  { %1003 = vmatprep.subr.bf16.mxu1 %v1183_v0 }
 0x10c   :  { %1005 = vmatpush3.bf16.xpose.msra.mxu1 %v1004_v27 }
 0x10d   :  { %1006 = vmatprep.subr.bf16.mxu1 %v1183_v0 }
 0x110   :  { %v158_v31 = vpop.f32.mrb[0].mxu0 }
 0x111   :  { %v159_v51 = vadd.f32 %v806_v30, %v158_v31  ;;  %v885_v52 = vpop.f32.mrb[1].mxu0 }
 0x113   :  { %1074 = vtanh.f32 %v159_v51 }
 0x114   :  { %1008 = vmatpush3.bf16.xpose.msra.mxu1 %v1007_v53 }
 0x11d   :  { %v1355_v54 = vpop.eup %1074 }
 0x11e   :  { %v163_v34 = vmul.f32 %v1355_v54, %v1355_v54 }
 0x120   :  { %164 = vadd.xlane.f32.xlu0 %v163_v34 }
 0x1ad   :  { %v165_v35 = vpop.xlane.xlu0 %164 }
 0x1ae   :  { %1076 = vrsqrt.f32 %v165_v35  ;;  %vm166_vm3 = vcmp.gt.f32.partialorder %v165_v35, 0.0 }
 0x1b8   :  { %v1077_v55 = vpop.eup %1076 }
 0x1b9   :  { %v168_v56 = vsel %vm166_vm3, %v1077_v55, 1.0 }
 0x1ba   :  { %v169_v57 = vmul.f32 %v1355_v54, %v168_v56 }
 0x1bc   :  { %919 = vmatmul.mubr.f32.vlgmr.msra.gmra.mrb[0].mxu1 %v169_v57 }
 0x28f   :  { %v348_v60 = vpop.f32.mrb[0].mxu1 }
 0x290   :  { %v1363_v61 = vclamps-f32 %v348_v60, 1.0  ;;  %v920_v62 = vpop.f32.mrb[1].mxu1 }
 0x292   :  { %v357_v63 = vsel %vm356_vm4, %v1363_v61, -3.0 }
 0x293   :  { %358 = vmax.xlane.f32.xlu1 %v357_v63 }
 0x320   :  { %v359_v2 = vpop.xlane.xlu1 %358 }
 0x321   :  { %vm360_vm5 = vcmp.eq.f32.partialorder %v357_v63, %v359_v2 }
 0x322   :  { %v361_v3 = vsel %vm360_vm5, %v1360_v59, 128  ;;  %vm516_vm5 = vcmask 64512  }
 0x323   :  { %v363_v4 = vshra.s32 %v361_v3, 16  ;;  %v362_v6 = vand.u32 65535, %v361_v3 }
 0x325   :  { %v365_v5 = vcvt.s32.f32 %v363_v4  ;;  %v364_v8 = vcvt.s32.f32 %v362_v6 }
 0x327   :  { %366 = vmin.xlane.f32.xlu0 %v365_v5 }
 0x3b4   :  { %v367_v7 = vpop.xlane.xlu0 %366 }
 0x3b5   :  { %vm368_vm6 = vcmp.eq.f32.partialorder %v365_v5, %v367_v7  ;;  %v373_v10 = vcvt.f32.s32 %v367_v7 }
 0x3b6   :  { %v369_v9 = vsel %vm368_vm6, %v364_v8, inf }
 0x3b7   :  { %370 = vmin.xlane.f32.xlu1 %v369_v9  ;;  %v374_v12 = vshll.u32 %v373_v10, 16 }
 0x444   :  { %v371_v11 = vpop.xlane.xlu1 %370 }
 0x445   :  { %v372_v13 = vcvt.f32.s32 %v371_v11 }
 0x447   :  { %v375_v14 = vadd.s32 %v374_v12, %v372_v13 }
 0x449   :  { %vm376_vm7 = vcmp.eq.s32.totalorder %v1360_v59, %v375_v14 }
 0x44a   :  { %v378_v15 = vsel %vm376_vm7, -2.0, %v357_v63  ;;  %v377_v37 = vsel %vm376_vm7, %v1363_v61, 0.0 }
 0x44b   :  { %379 = vmax.xlane.f32.xlu0 %v378_v15 }
 0x4d8   :  { %v380_v16 = vpop.xlane.xlu0 %379 }
 0x4d9   :  { %vm381_vm8 = vcmp.eq.f32.partialorder %v378_v15, %v380_v16 }
 0x4da   :  { %v382_v17 = vsel %vm381_vm8, %v1360_v59, 128 }
 0x4db   :  { %v384_v20 = vshra.s32 %v382_v17, 16  ;;  %v383_v24 = vand.u32 65535, %v382_v17 }
 0x4dd   :  { %v386_v21 = vcvt.s32.f32 %v384_v20  ;;  %v385_v28 = vcvt.s32.f32 %v383_v24 }
 0x4df   :  { %387 = vmin.xlane.f32.xlu1 %v386_v21 }
 0x56c   :  { %v388_v25 = vpop.xlane.xlu1 %387 }
 0x56d   :  { %vm389_vm9 = vcmp.eq.f32.partialorder %v386_v21, %v388_v25  ;;  %v394_v19 = vcvt.f32.s32 %v388_v25 }
 0x56e   :  { %v390_v18 = vsel %vm389_vm9, %v385_v28, inf }
 0x56f   :  { %391 = vmin.xlane.f32.xlu0 %v390_v18  ;;  %v395_v32 = vshll.u32 %v394_v19, 16 }
 0x5fc   :  { %v392_v29 = vpop.xlane.xlu0 %391 }
 0x5fd   :  { %v393_v33 = vcvt.f32.s32 %v392_v29 }
 0x5ff   :  { %v396_v36 = vadd.s32 %v395_v32, %v393_v33 }
 0x601   :  { %vm397_vm10 = vcmp.eq.s32.totalorder %v1360_v59, %v396_v36 }
 0x602   :  { %v399_v38 = vsel %vm397_vm10, -2.0, %v378_v15  ;;  %v398_v39 = vsel %vm397_vm10, %v1363_v61, %v377_v37 }
 0x603   :  { %400 = vmax.xlane.f32.xlu1 %v399_v38 }
 0x690   :  { %v401_v22 = vpop.xlane.xlu1 %400 }
 0x691   :  { %vm402_vm11 = vcmp.eq.f32.partialorder %v399_v38, %v401_v22 }
 0x692   :  { %v403_v23 = vsel %vm402_vm11, %v1360_v59, 128 }
 0x693   :  { %v405_v40 = vshra.s32 %v403_v23, 16  ;;  %v404_v42 = vand.u32 65535, %v403_v23 }
 0x695   :  { %v407_v41 = vcvt.s32.f32 %v405_v40  ;;  %v406_v44 = vcvt.s32.f32 %v404_v42 }
 0x697   :  { %408 = vmin.xlane.f32.xlu0 %v407_v41 }
 0x724   :  { %v409_v43 = vpop.xlane.xlu0 %408 }
 0x725   :  { %vm410_vm12 = vcmp.eq.f32.partialorder %v407_v41, %v409_v43  ;;  %v415_v46 = vcvt.f32.s32 %v409_v43 }
 0x726   :  { %v411_v45 = vsel %vm410_vm12, %v406_v44, inf }
 0x727   :  { %412 = vmin.xlane.f32.xlu1 %v411_v45  ;;  %v416_v27 = vshll.u32 %v415_v46, 16 }
 0x7b4   :  { %v413_v26 = vpop.xlane.xlu1 %412 }
 0x7b5   :  { %v414_v47 = vcvt.f32.s32 %v413_v26 }
 0x7b7   :  { %v417_v48 = vadd.s32 %v416_v27, %v414_v47 }
 0x7b9   :  { %vm418_vm13 = vcmp.eq.s32.totalorder %v1360_v59, %v417_v48 }
 0x7ba   :  { %v420_v49 = vsel %vm418_vm13, -2.0, %v399_v38  ;;  %v419_v50 = vsel %vm418_vm13, %v1363_v61, %v398_v39 }
 0x7bb   :  { %421 = vmax.xlane.f32.xlu0 %v420_v49 }
 0x848   :  { %v422_v30 = vpop.xlane.xlu0 %421 }
 0x849   :  { %vm423_vm14 = vcmp.eq.f32.partialorder %v420_v49, %v422_v30 }
 0x84a   :  { %v424_v31 = vsel %vm423_vm14, %v1360_v59, 128 }
 0x84b   :  { %v426_v51 = vshra.s32 %v424_v31, 16  ;;  %v425_v53 = vand.u32 65535, %v424_v31 }
 0x84d   :  { %v428_v52 = vcvt.s32.f32 %v426_v51  ;;  %v427_v35 = vcvt.s32.f32 %v425_v53 }
 0x84f   :  { %429 = vmin.xlane.f32.xlu1 %v428_v52 }
 0x8dc   :  { %v430_v34 = vpop.xlane.xlu1 %429 }
 0x8dd   :  { %vm431_vm15 = vcmp.eq.f32.partialorder %v428_v52, %v430_v34  ;;  %v436_v56 = vcvt.f32.s32 %v430_v34 }
 0x8de   :  { %v432_v55 = vsel %vm431_vm15, %v427_v35, inf }
 0x8df   :  { %433 = vmin.xlane.f32.xlu0 %v432_v55  ;;  %v437_v58 = vshll.u32 %v436_v56, 16 }
 0x96c   :  { %v434_v57 = vpop.xlane.xlu0 %433 }
 0x96d   :  { %v435_v60 = vcvt.f32.s32 %v434_v57 }
 0x96f   :  { %v438_v62 = vadd.s32 %v437_v58, %v435_v60 }
 0x971   :  { %vm439_vm1 = vcmp.eq.s32.totalorder %v1360_v59, %v438_v62 }
 0x972   :  { %v441_v63 = vsel %vm439_vm1, -2.0, %v420_v49  ;;  %v440_v2 = vsel %vm439_vm1, %v1363_v61, %v419_v50 }
 0x973   :  { %442 = vmax.xlane.f32.xlu1 %v441_v63 }
 0xa00   :  { %v443_v3 = vpop.xlane.xlu1 %442 }
 0xa01   :  { %vm444_vm2 = vcmp.eq.f32.partialorder %v441_v63, %v443_v3 }
 0xa02   :  { %v445_v4 = vsel %vm444_vm2, %v1360_v59, 128 }
 0xa03   :  { %v447_v5 = vshra.s32 %v445_v4, 16  ;;  %v446_v7 = vand.u32 65535, %v445_v4 }
 0xa05   :  { %v449_v6 = vcvt.s32.f32 %v447_v5  ;;  %v448_v9 = vcvt.s32.f32 %v446_v7 }
 0xa07   :  { %450 = vmin.xlane.f32.xlu0 %v449_v6 }
 0xa94   :  { %v451_v8 = vpop.xlane.xlu0 %450 }
 0xa95   :  { %vm452_vm3 = vcmp.eq.f32.partialorder %v449_v6, %v451_v8  ;;  %v457_v11 = vcvt.f32.s32 %v451_v8 }
 0xa96   :  { %v453_v10 = vsel %vm452_vm3, %v448_v9, inf }
 0xa97   :  { %454 = vmin.xlane.f32.xlu1 %v453_v10  ;;  %v458_v13 = vshll.u32 %v457_v11, 16 }
 0xb24   :  { %v455_v12 = vpop.xlane.xlu1 %454 }
 0xb25   :  { %v456_v14 = vcvt.f32.s32 %v455_v12 }
 0xb27   :  { %v459_v15 = vadd.s32 %v458_v13, %v456_v14  ;;  %v783_v14 = vstv %s782_s6 }
 0xb29   :  { %vm460_vm4 = vcmp.eq.s32.totalorder %v1360_v59, %v459_v15  ;;  %v785_v15 = vstv %s1447_s4 }
 0xb2a   :  { %v1385_v16 = vsel %vm460_vm4, %v1363_v61, %v440_v2 }
 0xb2b   :  { %484 = vxpose.xlu1.b32.start.end [1/1] (short) %v1385_v16, 128  ;;  %462 = vadd.xlane.f32.xlu0 %v1385_v16  ;;  %v475_v46 = vrot.slane %v1385_v16, 4 }
 0xb2d   :  { %v476_v26 = vadd.f32 %v475_v46, %v1385_v16 }
 0xb2f   :  { %v477_v27 = vrot.slane %v476_v26, 2 }
 0xb31   :  { %v478_v50 = vadd.f32 %v477_v27, %v476_v26 }
 0xb33   :  { %v479_v52 = vrot.slane %v478_v50, 1 }
 0xb35   :  { %v480_v35 = vadd.f32 %v479_v52, %v478_v50 }
 0xb37   :  { %v481_v58 = vadd.f32 1e-06, %v480_v35 }
 0xbab   :  { %v500_v17 = vpop.trf.xlu1 }
 0xbac   :  { %923 = vmatprep.mubr.msk.f32.mxu0 %vm516_vm5, %v500_v17 }
 0xbaf   :  { %v501_v20 = vpop.trf.xlu1 }
 0xbb3   :  { %v502_v21 = vpop.trf.xlu1 }
 0xbb7   :  { %v503_v24 = vpop.trf.xlu1 }
 0xbb8   :  { %v463_v25 = vpop.xlane.xlu0 %462 }
 0xbb9   :  { %1078 = vrsqrt.f32 %v463_v25  ;;  %vm466_vm6 = vcmp.eq.f32.partialorder %v463_v25, inf  ;;  %v469_v61 = vand.u32 2147483648, %v463_v25  ;;  %vm468_vm7 = vcmp.eq.f32.partialorder %v463_v25, 0.0 }
 0xbbb   :  { %v504_v28 = vpop.trf.xlu1 }
 0xbbf   :  { %v505_v18 = vpop.trf.xlu1 }
 0xbc3   :  { %v1079_v19 = vpop.eup %1078  ;;  %v506_v59 = vpop.trf.xlu1 }
 0xbc4   :  { %v465_v29 = vmul.f32 %v1079_v19, %v463_v25 }
 0xbc6   :  { %v467_v32 = vsel %vm466_vm6, %v463_v25, %v465_v29 }
 0xbc7   :  { %v470_v33 = vsel %vm468_vm7, %v469_v61, %v467_v32  ;;  %v507_v36 = vpop.trf.xlu1 }
 0xbc8   :  { %v471_v37 = vadd.f32 1e-06, %v470_v33 }
 0xbca   :  { %1080 = vrcp.f32 %v471_v37 }
 0xbcb   :  { %v508_v38 = vpop.trf.xlu1  ;;  %1082 = vrcp.f32 %v481_v58 }
 0xbcf   :  { %v509_v39 = vpop.trf.xlu1 }
 0xbd3   :  { %v510_v23 = vpop.trf.xlu1 }
 0xbd4   :  { %v1390_v22 = vpop.eup %1080 }
 0xbd5   :  { %v474_v40 = vmul.f32 %v1390_v22, %v1355_v54  ;;  %v1083_v10 = vpop.eup %1082 }
 0xbd6   :  { %v710_v12 = vmul.f32 %v1083_v10, %v1385_v16 }
 0xbd7   :  { %921 = vmatprep.subr.mxu0 %v474_v40  ;;  %v511_v41 = vpop.trf.xlu1 }
 0xbd8   :  { %922 = vmatpush3.msra.mxu0 %v474_v40 }
 0xbd9   :  { %924 = vmatmul.mubr.msk.f32.vlgmr.msra.gmra.mrb[2].mxu0 %vm516_vm5, %v501_v20  ;;  %1009 = vmatprep.subr.bf16.mxu0 %v1183_v0 }
 0xbda   :  { %926 = vmatprep.mubr.msk.f32.mxu0 %vm516_vm5, %v502_v21 }
 0xbdb   :  { %v512_v42 = vpop.trf.xlu1 }
 0xbdd   :  { %927 = vmatmul.mubr.msk.f32.gmra.mrb[4].mxu0 %vm516_vm5, %v503_v24 }
 0xbde   :  { %929 = vmatprep.mubr.msk.f32.mxu0 %vm516_vm5, %v504_v28 }
 0xbdf   :  { %v513_v43 = vpop.trf.xlu1 }
 0xbe1   :  { %930 = vmatmul.mubr.msk.f32.gmra.mrb[6].mxu0 %vm516_vm5, %v505_v18 }
 0xbe2   :  { %932 = vmatprep.mubr.msk.f32.mxu0 %vm516_vm5, %v506_v59 }
 0xbe3   :  { %v514_v44 = vpop.trf.xlu1 }
 0xbe5   :  { %933 = vmatmul.mubr.msk.f32.gmra.mrb[8].mxu0 %vm516_vm5, %v507_v36 }
 0xbe6   :  { %935 = vmatprep.mubr.msk.f32.mxu0 %vm516_vm5, %v508_v38 }
 0xbe7   :  { %v515_v45 = vpop.trf.xlu1 }
 0xbe9   :  { %936 = vmatmul.mubr.msk.f32.gmra.mrb[10].mxu0 %vm516_vm5, %v509_v39 }
 0xbea   :  { %938 = vmatprep.mubr.msk.f32.mxu0 %vm516_vm5, %v510_v23 }
 0xbed   :  { %939 = vmatmul.mubr.msk.f32.gmra.mrb[12].mxu0 %vm516_vm5, %v511_v41 }
 0xbee   :  { %941 = vmatprep.mubr.msk.f32.mxu0 %vm516_vm5, %v512_v42 }
 0xbf1   :  { %942 = vmatmul.mubr.msk.f32.gmra.mrb[14].mxu0 %vm516_vm5, %v513_v43 }
 0xbf2   :  { %944 = vmatprep.mubr.msk.f32.mxu0 %vm516_vm5, %v514_v44 }
 0xbf5   :  { %945 = vmatmul.mubr.msk.f32.gmra.mrb[16].mxu0 %vm516_vm5, %v515_v45 }
 0xbf6   :  { %979 = vmatprep.mubr.msk.f32.mxu0 %vm1184_vm0, %v1185_v1 }
 0xcac   :  { %v925_v47 = vpop.f32.mrb[2].mxu0 }
 0xcad   :  { %v631_v48 = vpop.f32.mrb[3].mxu0 }
 0xcae   :  { %v1010_v49 = vpack.c.bf16 %v925_v47, %v631_v48 }
 0xcb0   :  { %v928_v30 = vpop.f32.mrb[4].mxu0  ;;  %1011 = vmatpush3.bf16.msra.mxu0 %v1010_v49 }
 0xcb1   :  { %v641_v31 = vpop.f32.mrb[5].mxu0  ;;  %1012 = vmatprep.subr.bf16.mxu0 %v1183_v0 }
 0xcb2   :  { %v1013_v51 = vpack.c.bf16 %v928_v30, %v641_v31 }
 0xcb4   :  { %v931_v53 = vpop.f32.mrb[6].mxu0  ;;  %1014 = vmatpush3.bf16.msra.mxu0 %v1013_v51 }
 0xcb5   :  { %v651_v34 = vpop.f32.mrb[7].mxu0  ;;  %1015 = vmatprep.subr.bf16.mxu0 %v1183_v0 }
 0xcb6   :  { %v1016_v1 = vpack.c.bf16 %v931_v53, %v651_v34 }
 0xcb8   :  { %v934_v55 = vpop.f32.mrb[8].mxu0  ;;  %1017 = vmatpush3.bf16.msra.mxu0 %v1016_v1 }
 0xcb9   :  { %v661_v56 = vpop.f32.mrb[9].mxu0  ;;  %1018 = vmatprep.subr.bf16.mxu0 %v1183_v0 }
 0xcba   :  { %v1019_v57 = vpack.c.bf16 %v934_v55, %v661_v56 }
 0xcbc   :  { %v937_v60 = vpop.f32.mrb[10].mxu0  ;;  %1020 = vmatpush3.bf16.msra.mxu0 %v1019_v57 }
 0xcbd   :  { %v671_v62 = vpop.f32.mrb[11].mxu0  ;;  %1021 = vmatprep.subr.bf16.mxu0 %v1183_v0 }
 0xcbe   :  { %v1022_v63 = vpack.c.bf16 %v937_v60, %v671_v62 }
 0xcc0   :  { %v940_v2 = vpop.f32.mrb[12].mxu0  ;;  %1023 = vmatpush3.bf16.msra.mxu0 %v1022_v63 }
 0xcc1   :  { %v681_v3 = vpop.f32.mrb[13].mxu0  ;;  %1024 = vmatprep.subr.bf16.mxu0 %v1183_v0 }
 0xcc2   :  { %v1025_v4 = vpack.c.bf16 %v940_v2, %v681_v3 }
 0xcc4   :  { %v943_v5 = vpop.f32.mrb[14].mxu0  ;;  %1026 = vmatpush3.bf16.msra.mxu0 %v1025_v4 }
 0xcc5   :  { %v691_v6 = vpop.f32.mrb[15].mxu0  ;;  %1027 = vmatprep.subr.bf16.mxu0 %v1183_v0 }
 0xcc6   :  { %v1028_v7 = vpack.c.bf16 %v943_v5, %v691_v6 }
 0xcc8   :  { %v946_v8 = vpop.f32.mrb[16].mxu0  ;;  %1029 = vmatpush3.bf16.msra.mxu0 %v1028_v7 }
 0xcc9   :  { %v701_v9 = vpop.f32.mrb[17].mxu0  ;;  %1030 = vmatprep.subr.bf16.mxu0 %v1183_v0  ;;  %v784_v0 = vmul.f32 %v1355_v54, %v783_v14 }
 0xcca   :  { %v1031_v11 = vpack.c.bf16 %v946_v8, %v701_v9 }
 0xccc   :  { %1032 = vmatpush3.bf16.msra.mxu0 %v1031_v11 }
 0xccf   :  { %980 = vmatmul.mubr.f32.vlgmr.msra.gmra.mrb[18].mxu0 %v710_v12 }
 0xda2   :  { %v777_v13 = vpop.f32.mrb[18].mxu0 }
 0xda3   :  { %v781_v17 = vmul.f32 %v1390_v22, %v777_v13  ;;  %v981_v20 = vpop.f32.mrb[19].mxu0 }
 0xda5   :  { %v786_v21 = vmul.f32 %v785_v15, %v781_v17 }
 0xda7   :  { %v787_v16 = vadd.f32 %v786_v21, %v784_v0 }
 0xda9   :  { %v788_v24 = vadd.f32 %v1355_v54, %v787_v16 }
 0xdab   :  { %789 = vst [vmem:[#allocation9] sm:$0xff] %v788_v24 }
 0xdac   :  { %1161 = shalt.err (!%p1158_p0)
}
 0xdad   :  { %s1162_s13 = scalar_lea.hbm %s1448_s5, 128 }
 0xdae   :  { %p1163_p1 = scmp.ne.s32.totalorder %s1448_s5, %s1162_s13  ;;  %p1166_p2 = scmp.lt.u32.totalorder %s1162_s13, %s1448_s5 }
 0xdb0   :  { %p1168_p3 = pnand %p1166_p2, %p1163_p1 }
 0xdb2   :  { %1171 = shalt.err (!%p1168_p3)
}
 0xdb3   :  { %799 = dma.vmem_to_hbm [thread:$0]  %s797_s10, 128, %s1448_s5, [#allocation5]  }
 0xdb4   :  { %1176 = dma.done.wait [#allocation5], 128  }
 0xdb5   :  { %1177 = vsyncadd [#allocation5], 4294967168 }
 0xdb6   :  { %803 = vsyncpa [#allocation4], 1 }
 0xdb7   :  { %804 = vsyncpa [#allocation7], 1 }
 0xdb8   :  { %805 = vsyncpa [#allocation5], 1 }

</bundles_post_ra>
